<compile_context>
chip_gen: v5e
topology: v5e:2x2
jax: 0.10.0
libtpu: 0.0.40
codegen_flags: <defaults>
</compile_context>

<pallas_src>
from typing import Dict, Optional

import numpy as np
import jax
import jax.numpy as jnp
from jax.experimental import pallas as pl
from jax.experimental.pallas import tpu as pltpu

_SUBLANES = 8
_LANES = 128
_TILE_ELEMS = _SUBLANES * _LANES  # 1024 emotion slots per (8, 128) tile


def _sum_kernel(x_ref, o_ref):
    # Full-tile reduction (VPU + XLU cross-lane reduce); scalar result goes out
    # via SMEM, the cheap idiomatic path for reductions.
    o_ref[0, 0] = jnp.sum(x_ref[...])


@jax.jit
def _device_sum(tile: jnp.ndarray) -> jnp.ndarray:
    """tile: (8, 128*k) float32, zero-padded. Returns (1,) float32 total sum."""
    rows, lanes = tile.shape  # static at trace time; jit caches per shape
    out = pl.pallas_call(
        _sum_kernel,
        out_shape=jax.ShapeDtypeStruct((1, 1), jnp.float32),
        in_specs=[pl.BlockSpec((rows, lanes), lambda: (0, 0))],
        out_specs=pl.BlockSpec(memory_space=pltpu.MemorySpace.SMEM),
    )(tile)
    return out.reshape(1)  # fused into the same executable; matches torch shape (1,)


class EmotionalStateNetwork:
    """JAX/Pallas port of the PyTorch EmotionalStateNetwork (no parameters)."""

    def __init__(self, config: Dict):
        # Original nn.Module.__init__ registers no parameters/buffers.
        self.config = config

    def forward(self, emotion_values: Optional[Dict[str, float]]) -> jnp.ndarray:
        if emotion_values is None:
            return jnp.zeros((1,), dtype=jnp.float32)

        vals = list(emotion_values.values())
        n = len(vals)
        if n == 0:
            # sum(()) == 0.0; skip the device round-trip entirely.
            return jnp.zeros((1,), dtype=jnp.float32)

        # One lane-dense block; if n > 1024 widen the lane axis (still one grid
        # point — a wider block is strictly cheaper than a sequential grid here).
        n_tiles = -(-n // _TILE_ELEMS)  # ceil(n / 1024)
        tile = np.zeros((_SUBLANES, _LANES * n_tiles), dtype=np.float32)
        tile.reshape(-1)[:n] = np.asarray(vals, dtype=np.float32)

        # TODO(synk): padding/masking could alternatively be fused in-kernel via
        # PrefetchScalarGridSpec(num_scalar_prefetch=1) + iota mask; host numpy
        # zero-padding already removes all extra device kernels, so it is skipped.
        return _device_sum(tile)

    __call__ = forward


if __name__ == "__main__":
    key = jax.random.PRNGKey(0)
    emotion_names = ["joy", "fear", "anger", "sadness", "surprise", "trust"]
    raw = jax.random.uniform(key, (len(emotion_names),), dtype=jnp.float32)
    emotion_values = {name: float(v) for name, v in zip(emotion_names, raw)}

    net = EmotionalStateNetwork(config={})

    # Non-None path (kernel)
    out = jax.block_until_ready(net(emotion_values))
    expected = sum(emotion_values.values())
    assert out.shape == (1,) and out.dtype == jnp.float32
    assert abs(float(out[0]) - expected) < 1e-4, (float(out[0]), expected)

    # None path (matches torch.zeros(1))
    zero_out = jax.block_until_ready(net(None))
    assert zero_out.shape == (1,) and float(zero_out[0]) == 0.0

    # Empty dict -> sum(()) == 0.0 (host short-circuit, matches torch)
    empty_out = jax.block_until_ready(net({}))
    assert empty_out.shape == (1,) and float(empty_out[0]) == 0.0

    # > 1024 values: single widened lane-dense block (no grid), separate jit cache entry
    big_vals = {f"e{i}": float(i % 7) * 0.125 for i in range(1500)}
    big_out = jax.block_until_ready(net(big_vals))
    assert abs(float(big_out[0]) - sum(big_vals.values())) < 1e-2

    print("KERNEL_OK")
</pallas_src>

<mosaic_0001>
module attributes {stable_mosaic.version = 11 : i64} {
  func.func @_sum_kernel(%arg0: memref<8x128xf32, #tpu.memory_space<vmem>>, %arg1: memref<1x1xf32, #tpu.memory_space<smem>>) attributes {dimension_semantics = [], scalar_prefetch = 0 : i64, scratch_operands = 0 : i64, tpu.core_type = #tpu.core_type<tc>} {
    %c0 = arith.constant 0 : index
    %c0_0 = arith.constant 0 : index
    %0 = vector.load %arg0[%c0, %c0_0] : memref<8x128xf32, #tpu.memory_space<vmem>>, vector<8x128xf32>
    %1 = vector.shape_cast %0 : vector<8x128xf32> to vector<1x8x128xf32>
    %cst = arith.constant dense<0.000000e+00> : vector<1xf32>
    %2 = vector.multi_reduction <add>, %1, %cst [1, 2] : vector<1x8x128xf32> to vector<1xf32>
    %3 = vector.shape_cast %2 : vector<1xf32> to vector<1x1x1xf32>
    %4 = vector.extract %3[0, 0, 0] : f32 from vector<1x1x1xf32>
    %c0_1 = arith.constant 0 : index
    %c0_2 = arith.constant 0 : index
    %5 = memref.load %arg1[%c0_1, %c0_2] : memref<1x1xf32, #tpu.memory_space<smem>>
    memref.store %4, %arg1[%c0_1, %c0_2] : memref<1x1xf32, #tpu.memory_space<smem>>
    return
  }
}

</mosaic_0001>

<bundles_post_ra>
// kernel: _device_sum.1
= control target key start
LH: loop header
LB: loop body
LE: loop exit
PB: predicated region body
PF: predicated region fallthrough
CT: control target
= control target key end

     0   :  { %6 = vsyncpa [#allocation3], 0  ;;  %s113_s0 = inlined_call_operand.hbm [shape: f32[8,128], index: 0, kind: input, shape index: {}]   ;;  %s114_s1 = inlined_call_operand.hbm [shape: f32[1,1], index: 1, kind: output, shape index: {}]  }
   0x1   :  { %7 = vsyncpa [#allocation4], 0  ;;  %s13_s8 = sshll.u32 %s113_s0, 4  ;;  %s95_s9 = smov [#allocation2]   ;;  %s14_s8 = int_to_ptr.hbm [resolvable:$true] %s13_s8 }
   0x2   :  { %s15_s10 = sshll.u32 %s95_s9, 4  ;;  %s16_s10 = int_to_ptr.vmem [resolvable:$true] %s15_s10 }
   0x3   :  { %18 = dma.hbm_to_vmem [thread:$0]  %s14_s8, 128, %s16_s10, [#allocation3]  }
   0x4   :  { %91 = dma.done.wait [#allocation3], 128  }
   0x5   :  { %92 = vsyncadd [#allocation3], 4294967168  ;;  %v23_v0 = vld [vmem:[#allocation2] sm:$0xff]  ;;  %s40_s0 = sshll.u32 %s114_s1, 4  ;;  %s96_s14 = smov [#allocation5]   ;;  %s41_s0 = int_to_ptr.hbm [resolvable:$true] %s40_s0 }
   0x6   :  { %24 = vadd.xlane.f32.xlu0 %v23_v0 }
  0x79   :  { %v25_v1 = vpop.xlane.xlu0 %24 }
  0x7a   :  { %v26_v2 = vrot.slane %v25_v1, 4 }
  0x7c   :  { %v27_v3 = vadd.f32 %v26_v2, %v25_v1 }
  0x7e   :  { %v28_v4 = vrot.slane %v27_v3, 2 }
  0x80   :  { %v29_v5 = vadd.f32 %v28_v4, %v27_v3 }
  0x82   :  { %v30_v6 = vrot.slane %v29_v5, 1 }
  0x84   :  { %v31_v7 = vadd.f32 %v30_v6, %v29_v5 }
  0x86   :  { %51 = vpush %v31_v7 }
  0xb7   :  { %s52_s13 = spop %51 }
  0xb8   :  { %34 = sst [smem:[#allocation5]] %s52_s13 }
  0xb9   :  { %43 = dma.smem_to_hbm %s96_s14, 16, %s41_s0, [#allocation4]  }
  0xba   :  { %93 = dma.done.wait [#allocation4], 16  }
  0xbb   :  { %94 = vsyncadd [#allocation4], 4294967280 }
  0xbc   :  { %48 = sfence }
  0xbd   :  { %49 = vsyncpa [#allocation3], 1 }
  0xbe   :  { %50 = vsyncpa [#allocation4], 1 }

</bundles_post_ra>
